<compile_context>
chip_gen: v7x
topology: tpu7x:2x2x1
jax: 0.10.0
libtpu: 0.0.40
codegen_flags: <defaults>
</compile_context>

<pallas_src>
import math
import numpy as np
import jax
import jax.numpy as jnp
from jax import lax
from jax.experimental import pallas as pl
from jax.experimental.pallas import tpu as pltpu


# ---------------------------------------------------------------------------
# Pallas kernel: fused implicit-GEMM conv for one image.
#   x_ref: (H, W*C) bf16     w_ref: (K, W*C, OW*O) bf16 (VMEM-resident)
#   b_ref: (1, OW*O) f32     o_ref: (OH, OW*O) f32
# ---------------------------------------------------------------------------
def _banded_conv_kernel(out_h, stride, ksize):
    def kernel(x_ref, w_ref, b_ref, o_ref):
        xv = x_ref[...]                                    # (H, W*C) bf16
        wc = xv.shape[1]
        owo = o_ref.shape[1]
        acc = jnp.zeros((out_h, owo), jnp.float32)
        for kh in range(ksize):                            # K static & tiny -> unrolled
            if stride == 1:
                lhs = xv[kh:kh + out_h, :]                 # plain sublane slice
            else:
                lhs = lax.slice(xv, (kh, 0),
                                (kh + (out_h - 1) * stride + 1, wc),
                                (stride, 1))
            acc = acc + jnp.dot(lhs, w_ref[kh],
                                preferred_element_type=jnp.float32)
        o_ref[...] = acc + b_ref[...]                      # f32, lane-dense store
    return kernel


def conv_banded_pallas(x_slab, big_w, bias_row, *, out_h, stride):
    """x_slab: (B, H, W*C) bf16; big_w: (K, W*C, OW*O) bf16; bias_row: (1, OW*O) f32."""
    B, H, WC = x_slab.shape
    K, WC2, OWO = big_w.shape
    assert WC == WC2

    flops = 2 * B * K * out_h * WC * OWO
    bytes_accessed = (x_slab.size * x_slab.dtype.itemsize
                      + big_w.size * big_w.dtype.itemsize
                      + bias_row.size * bias_row.dtype.itemsize
                      + B * out_h * OWO * 4)

    return pl.pallas_call(
        _banded_conv_kernel(out_h, stride, K),
        out_shape=jax.ShapeDtypeStruct((B, out_h, OWO), jnp.float32),
        grid_spec=pltpu.PrefetchScalarGridSpec(
            num_scalar_prefetch=0,
            grid=(B,),
            in_specs=[
                pl.BlockSpec((None, H, WC), lambda b: (b, 0, 0)),   # one image / step
                pl.BlockSpec((K, WC, OWO), lambda b: (0, 0, 0)),    # weight: VMEM-resident
                pl.BlockSpec((1, OWO), lambda b: (0, 0)),           # bias:   VMEM-resident
            ],
            out_specs=pl.BlockSpec((None, out_h, OWO), lambda b: (b, 0, 0)),
        ),
        compiler_params=pltpu.CompilerParams(
            dimension_semantics=("parallel",)),                     # megacore on v7x
        cost_estimate=pl.CostEstimate(flops=flops, transcendentals=0,
                                      bytes_accessed=bytes_accessed),
    )(x_slab, big_w, bias_row)


# ---------------------------------------------------------------------------
# Module glue: deterministic init + one-time weight packing.  Only raw-size
# layout plumbing (NCHW<->NHWC of un-expanded activations) stays in XLA; the
# K^2 im2col expansion never touches HBM.
# ---------------------------------------------------------------------------
class Conv2dviaLinearPallas:
    """Default (mask=False, mask_conv=False) path of the PyTorch Conv2dviaLinear."""

    def __init__(self, in_channels, out_channels, kernel_size, stride=1, key=None):
        self.in_channels = in_channels
        self.out_channels = out_channels
        self.kernel_size = kernel_size
        self.stride = stride

        # Deterministic init mimicking nn.Conv2d defaults (uniform +-1/sqrt(fan_in)).
        key = jax.random.PRNGKey(0) if key is None else key
        kw, kb = jax.random.split(key)
        fan_in = in_channels * kernel_size * kernel_size
        bound = 1.0 / math.sqrt(fan_in)
        self.orig_weight = jax.random.uniform(
            kw, (out_channels, in_channels, kernel_size, kernel_size),
            minval=-bound, maxval=bound, dtype=jnp.float32)
        self.orig_bias = jax.random.uniform(
            kb, (out_channels,), minval=-bound, maxval=bound, dtype=jnp.float32)

        self._packed = {}   # lazily built per input (H, W), like the torch lazy init

    def _out_hw(self, H, W):
        K, S = self.kernel_size, self.stride
        return (math.floor((H - K) / S + 1), math.floor((W - K) / S + 1))

    def _pack(self, H, W):
        cache_key = (H, W)
        if cache_key in self._packed:
            return self._packed[cache_key]
        C, O = self.in_channels, self.out_channels
        K, S = self.kernel_size, self.stride
        OH, OW = self._out_hw(H, W)

        # Banded weight: BigW[kh][w*C+c, ow*O+o] = W[o,c,kh,kw] iff w == ow*S+kw.
        w_np = np.asarray(self.orig_weight, dtype=np.float32)         # (O, C, K, K)
        big = np.zeros((K, W * C, OW * O), dtype=np.float32)
        for kh in range(K):
            for kw_ in range(K):
                blk = w_np[:, :, kh, kw_].T                            # (C, O)
                for ow in range(OW):
                    col = ow * S + kw_
                    big[kh, col * C:(col + 1) * C, ow * O:(ow + 1) * O] = blk
        big_w = jnp.asarray(big, dtype=jnp.bfloat16)                   # (K, W*C, OW*O)
        bias_row = jnp.asarray(
            np.tile(np.asarray(self.orig_bias, np.float32), OW)).reshape(1, OW * O)

        packed = (big_w, bias_row, OH, OW)
        self._packed[cache_key] = packed
        return packed

    def __call__(self, x):
        B, C, H, W = x.shape
        assert C == self.in_channels
        big_w, bias_row, OH, OW = self._pack(H, W)

        # Raw-size layout plumbing only (interface is NCHW, kernel wants NHWC rows).
        x_slab = jnp.transpose(x, (0, 2, 3, 1)).reshape(B, H, W * C).astype(jnp.bfloat16)
        out_flat = conv_banded_pallas(x_slab, big_w, bias_row,
                                      out_h=OH, stride=self.stride)    # (B, OH, OW*O) f32
        out = out_flat.reshape(B, OH, OW, self.out_channels)
        return jnp.transpose(out, (0, 3, 1, 2))                        # NCHW module contract


# ---------------------------------------------------------------------------
# Demo / self-check
# ---------------------------------------------------------------------------
if __name__ == "__main__":
    key = jax.random.PRNGKey(0)
    kx, kp = jax.random.split(key)

    B, C, H, W = 2, 4, 16, 16
    O, K, S = 8, 3, 1

    x = jax.random.normal(kx, (B, C, H, W), dtype=jnp.float32)
    module = Conv2dviaLinearPallas(in_channels=C, out_channels=O,
                                   kernel_size=K, stride=S, key=kp)
    out = jax.block_until_ready(module(x))
    OH, OW = module._out_hw(H, W)
    assert out.shape == (B, O, OH, OW), out.shape

    # Check 1 (tight): identical bf16-operand / f32-accumulation math in plain XLA.
    big_w, bias_row, _, _ = module._pack(H, W)
    x_slab = jnp.transpose(x, (0, 2, 3, 1)).reshape(B, H, W * C).astype(jnp.bfloat16)
    xs32, bw32 = x_slab.astype(jnp.float32), big_w.astype(jnp.float32)
    ref_flat = jnp.zeros((B, OH, OW * O), jnp.float32)
    for kh in range(K):
        ref_flat = ref_flat + jnp.einsum('bhk,kn->bhn',
                                         xs32[:, kh:kh + OH, :], bw32[kh],
                                         precision=lax.Precision.HIGHEST)
    ref_flat = ref_flat + bias_row
    ref_tight = ref_flat.reshape(B, OH, OW, O).transpose(0, 3, 1, 2)
    np.testing.assert_allclose(np.asarray(out), np.asarray(ref_tight),
                               rtol=1e-4, atol=1e-4)

    # Check 2 (semantics): forward equals conv2d(x, W, b, stride, 'VALID').
    # Loose tolerance covers the bf16 operand cast (f32 accumulation kept).
    ref = lax.conv_general_dilated(
        x, module.orig_weight, window_strides=(S, S), padding="VALID",
        dimension_numbers=("NCHW", "OIHW", "NCHW"),
        precision=lax.Precision.HIGHEST)
    ref = ref + module.orig_bias.reshape(1, O, 1, 1)
    np.testing.assert_allclose(np.asarray(out), np.asarray(ref),
                               rtol=3e-2, atol=3e-2)

    print("KERNEL_OK")
</pallas_src>

<mosaic_0001>
module attributes {stable_mosaic.version = 11 : i64} {
  func.func @kernel(%arg0: i32, %arg1: memref<1x16x64xbf16, #tpu.memory_space<vmem>>, %arg2: memref<3x64x112xbf16, #tpu.memory_space<vmem>>, %arg3: memref<1x112xf32, #tpu.memory_space<vmem>>, %arg4: memref<1x14x112xf32, #tpu.memory_space<vmem>>) attributes {dimension_semantics = [#tpu.dimension_semantics<parallel>], iteration_bounds = array<i64: 2>, scalar_prefetch = 0 : i64, scratch_operands = 0 : i64, tpu.core_type = #tpu.core_type<tc>, window_params = [{transform_indices = @transform_0, window_bounds = array<i64: 1, 16, 64>}, {pipeline_mode = #tpu.pipeline_mode<synchronous>, transform_indices = @transform_1, window_bounds = array<i64: 3, 64, 112>}, {pipeline_mode = #tpu.pipeline_mode<synchronous>, transform_indices = @transform_2, window_bounds = array<i64: 1, 112>}, {transform_indices = @transform_3, window_bounds = array<i64: 1, 14, 112>}]} {
    %c0 = arith.constant 0 : index
    %c0_0 = arith.constant 0 : index
    %c0_1 = arith.constant 0 : index
    %0 = vector.load %arg1[%c0, %c0_0, %c0_1] : memref<1x16x64xbf16, #tpu.memory_space<vmem>>, vector<1x16x64xbf16>
    %1 = vector.shape_cast %0 : vector<1x16x64xbf16> to vector<16x64xbf16>
    %cst = arith.constant 0.000000e+00 : f32
    %2 = vector.broadcast %cst : f32 to vector<14x112xf32>
    %3 = vector.extract_strided_slice %1 {offsets = [0, 0], sizes = [14, 64], strides = [1, 1]} : vector<16x64xbf16> to vector<14x64xbf16>
    %c0_2 = arith.constant 0 : index
    %c0_3 = arith.constant 0 : index
    %c0_4 = arith.constant 0 : index
    %4 = vector.load %arg2[%c0_2, %c0_3, %c0_4] : memref<3x64x112xbf16, #tpu.memory_space<vmem>>, vector<1x64x112xbf16>
    %5 = vector.shape_cast %4 : vector<1x64x112xbf16> to vector<64x112xbf16>
    %cst_5 = arith.constant dense<0.000000e+00> : vector<14x112xf32>
    %6 = tpu.matmul %3, %5, %cst_5 {dimension_numbers = #tpu.dot_dimension_numbers<[1], [0], [0], [1], [0, 0, 1, 1], [], []>} : vector<14x64xbf16>, vector<64x112xbf16>, vector<14x112xf32> -> vector<14x112xf32>
    %7 = arith.addf %2, %6 : vector<14x112xf32>
    %8 = vector.extract_strided_slice %1 {offsets = [1, 0], sizes = [14, 64], strides = [1, 1]} : vector<16x64xbf16> to vector<14x64xbf16>
    %c1 = arith.constant 1 : index
    %c0_6 = arith.constant 0 : index
    %c0_7 = arith.constant 0 : index
    %9 = vector.load %arg2[%c1, %c0_6, %c0_7] : memref<3x64x112xbf16, #tpu.memory_space<vmem>>, vector<1x64x112xbf16>
    %10 = vector.shape_cast %9 : vector<1x64x112xbf16> to vector<64x112xbf16>
    %cst_8 = arith.constant dense<0.000000e+00> : vector<14x112xf32>
    %11 = tpu.matmul %8, %10, %cst_8 {dimension_numbers = #tpu.dot_dimension_numbers<[1], [0], [0], [1], [0, 0, 1, 1], [], []>} : vector<14x64xbf16>, vector<64x112xbf16>, vector<14x112xf32> -> vector<14x112xf32>
    %12 = arith.addf %7, %11 : vector<14x112xf32>
    %13 = vector.extract_strided_slice %1 {offsets = [2, 0], sizes = [14, 64], strides = [1, 1]} : vector<16x64xbf16> to vector<14x64xbf16>
    %c2 = arith.constant 2 : index
    %c0_9 = arith.constant 0 : index
    %c0_10 = arith.constant 0 : index
    %14 = vector.load %arg2[%c2, %c0_9, %c0_10] : memref<3x64x112xbf16, #tpu.memory_space<vmem>>, vector<1x64x112xbf16>
    %15 = vector.shape_cast %14 : vector<1x64x112xbf16> to vector<64x112xbf16>
    %cst_11 = arith.constant dense<0.000000e+00> : vector<14x112xf32>
    %16 = tpu.matmul %13, %15, %cst_11 {dimension_numbers = #tpu.dot_dimension_numbers<[1], [0], [0], [1], [0, 0, 1, 1], [], []>} : vector<14x64xbf16>, vector<64x112xbf16>, vector<14x112xf32> -> vector<14x112xf32>
    %17 = arith.addf %12, %16 : vector<14x112xf32>
    %c0_12 = arith.constant 0 : index
    %c0_13 = arith.constant 0 : index
    %18 = vector.load %arg3[%c0_12, %c0_13] : memref<1x112xf32, #tpu.memory_space<vmem>>, vector<1x112xf32>
    %19 = vector.broadcast %18 : vector<1x112xf32> to vector<14x112xf32>
    %20 = arith.addf %17, %19 : vector<14x112xf32>
    %c0_14 = arith.constant 0 : index
    %c0_15 = arith.constant 0 : index
    %c0_16 = arith.constant 0 : index
    %21 = vector.load %arg4[%c0_14, %c0_15, %c0_16] : memref<1x14x112xf32, #tpu.memory_space<vmem>>, vector<1x14x112xf32>
    %22 = vector.shape_cast %21 : vector<1x14x112xf32> to vector<14x112xf32>
    %23 = vector.shape_cast %20 : vector<14x112xf32> to vector<1x14x112xf32>
    tpu.vector_store %arg4[%c0_14, %c0_15, %c0_16], %23 {strides = array<i32>} : memref<1x14x112xf32, #tpu.memory_space<vmem>>, vector<1x14x112xf32>,
    return
  }
  func.func @transform_0(%arg0: i32) -> (i32, i32, i32) {
    %c0_i32 = arith.constant 0 : i32
    %c0_i32_0 = arith.constant 0 : i32
    %c0_i32_1 = arith.constant 0 : i32
    return %arg0, %c0_i32, %c0_i32_0 : i32, i32, i32
  }
  func.func @transform_1(%arg0: i32) -> (i32, i32, i32) {
    %c0_i32 = arith.constant 0 : i32
    %c0_i32_0 = arith.constant 0 : i32
    %c0_i32_1 = arith.constant 0 : i32
    %c0_i32_2 = arith.constant 0 : i32
    return %c0_i32, %c0_i32_0, %c0_i32_1 : i32, i32, i32
  }
  func.func @transform_2(%arg0: i32) -> (i32, i32) {
    %c0_i32 = arith.constant 0 : i32
    %c0_i32_0 = arith.constant 0 : i32
    %c0_i32_1 = arith.constant 0 : i32
    return %c0_i32, %c0_i32_0 : i32, i32
  }
  func.func @transform_3(%arg0: i32) -> (i32, i32, i32) {
    %c0_i32 = arith.constant 0 : i32
    %c0_i32_0 = arith.constant 0 : i32
    %c0_i32_1 = arith.constant 0 : i32
    return %arg0, %c0_i32, %c0_i32_0 : i32, i32, i32
  }
}

</mosaic_0001>

<bundles_post_ra>
// kernel: tpu_custom_call.1
= control target key start
LH: loop header
LB: loop body
LE: loop exit
PB: predicated region body
PF: predicated region fallthrough
CT: control target
= control target key end

     0   :  { %8 = vsyncpa [#allocation3], 0  ;;  %s976_s0 = inlined_call_operand.hbm [shape: bf16[2,16,64], index: 0, kind: input, shape index: {}]   ;;  %s977_s1 = inlined_call_operand.hbm [shape: bf16[3,64,112], index: 1, kind: input, shape index: {}]   ;;  %s978_s2 = inlined_call_operand.vmem [shape: f32[1,112], index: 2, kind: input, shape index: {}]   ;;  %s979_s3 = inlined_call_operand.vmem [shape: f32[2,14,112], index: 3, kind: output, shape index: {}]  }
   0x1   :  { %10 = vsyncpa [#allocation3 + $0x1], 0 }
   0x2   :  { %11 = vsyncpa [#allocation5], 0  ;;  %s819_s12 = smov 0   ;;  %s821_s13 = smov 0  }
   0x3   :  { %s823_s14 = smov 0   ;;  %s825_s15 = smov 0  }
   0x4 LB: > { %s838_s16 = sadd.s32 4294967295, %s791_s15   ;;  %p37_p0 = scmp.ne.s32.totalorder %s783_s13, %s779_s12  ;;  %s791_s15 = sphi %s825_s15, %s994_s15   ;;  %s787_s14 = sphi %s823_s14, %s993_s14   ;;  %s783_s13 = sphi %s821_s13, %s992_s13   ;;  %s779_s12 = sphi %s819_s12, %s991_s12  }
   0x5   : > { %p980_p1 = scmp.eq.s32.totalorder %s838_s16, 0  ;;  %p545_p2 = scmp.ge.s32.totalorder %s791_s15, 1 }
   0x6   : > { %p116_p3 = scmp.lt.s32.totalorder %s791_s15, 3  ;;  %s793_s19 = smov [#allocation4]  }
   0x7   : > { %p846_p4 = por %p980_p1, %p37_p0  ;;  %s128_s20 = sshll.u32 %s793_s19, 4  ;;  %s129_s20 = int_to_ptr.vmem [resolvable:$true] %s128_s20 }
   0x8   : > { %p850_p5 = pnand %p545_p2, %p116_p3  ;;  %s863_s22 = sadd.s32 1, %s791_s15  }
   0x9   : > { %s983_s17 = scalar_select %p846_p4, 1, 0 }
   0xa   : > { %s984_s18 = scalar_select %p850_p5, 1, 0 }
   0xb   : > { %p634_p6 = pneg %p850_p5  ;;  %s24_s23 = sadd.s32 1, %s787_s14 }
   0xc   : > { %s21_s24 = ssub.s32 %s791_s15, %s863_s22  ;;  %s695_s27 = scalar_lea.hbm %s977_s1, 1536 }
   0xd   : > { %p858_p7 = pnand %p634_p6, %p980_p1  ;;  %p696_p8 = scmp.ne.s32.totalorder %s977_s1, %s695_s27 }
   0xe   : > { %p702_p12 = scmp.lt.u32.totalorder %s695_s27, %s977_s1 }
   0xf   : > { %p697_p9 = pneg %p858_p7 }
  0x11   : > { %p698_p10 = pnand %p697_p9, %p696_p8 }
  0x13   : > { %p699_p11 = pneg %p698_p10 }
  0x15   : > { %p704_p13 = pnand %p702_p12, %p699_p11 }
  0x17   : > { %707 = shalt.err (!%p704_p13)
}
  0x18   : > { %s708_s5 = scalar_lea.vmem %s129_s20, 1536  ;;  %p716_p6 = scmp.lt.s32.totalorder %s129_s20, %s129_s20 }
  0x19   : > { %p709_p0 = scmp.ne.s32.totalorder %s129_s20, %s708_s5  ;;  %p717_p1 = scmp.lt.s32.totalorder %s708_s5, %s708_s5 }
  0x1b   : > { %p711_p2 = pnand %p709_p0, %p697_p9  ;;  %p718_p4 = por %p717_p1, %p716_p6 }
  0x1d   : > { %p712_p3 = pneg %p711_p2 }
  0x1f   : > { %p719_p5 = pnand %p718_p4, %p712_p3 }
  0x21   : > { %722 = shalt.err (!%p719_p5)
}
  0x22   : > { %s794_s6 = smov 64   ;;  %s795_s7 = smov 4  }
  0x23   : > { %637 = dma.hbm_to_vmem [thread:$0]  (!%p858_p7), %s977_s1, 1536, %s129_s20, [#allocation5], %s794_s6, %s794_s6, %s795_s7  }
  0x24   : > { %p22_p1 = scmp.eq.s32.totalorder %s21_s24, 0  ;;  %p31_p4 = scmp.ne.s32.totalorder %s787_s14, %s783_s13 }
  0x25   : > { %p32_p5 = scmp.eq.s32.totalorder %s791_s15, 0  ;;  %p643_p8 = scmp.lt.s32.totalorder %s791_s15, 2 }
  0x26   : > { %s892_s10 = scalar_select %p22_p1, %s787_s14, %s24_s23  }
  0x27   : > { %p33_p9 = por %p32_p5, %p31_p4  ;;  %s145_s11 = sand.u32 1, %s787_s14  }
  0x28   : > { %s548_s12 = sshll.u32 %s145_s11, 3  ;;  %s575_s19 = sshll.u32 %s791_s15, 7 }
  0x29   : > { %s899_s21 = scalar_lea.hbm %s976_s0, %s575_s19  ;;  %s149_s20 = scalar_lea.vmem [#allocation2], %s548_s12 }
  0x2a   : > { %s156_s24 = sshll.u32 %s149_s20, 4  ;;  %p903_p7 = pnand %p643_p8, %p33_p9  ;;  %s901_s24 = int_to_ptr.vmem [resolvable:$true] %s156_s24 }
  0x2b   : > { %s907_s15 = scalar_lea.sflag [#allocation3], %s145_s11  ;;  %s723_s27 = scalar_lea.hbm %s899_s21, 128 }
  0x2c   : > { %p724_p10 = scmp.ne.s32.totalorder %s899_s21, %s723_s27  ;;  %p725_p11 = pneg %p903_p7 }
  0x2d   : > { %s728_s30 = scalar_lea.hbm %s976_s0, 256  ;;  %p729_p0 = scmp.lt.u32.totalorder %s899_s21, %s976_s0 }
  0x2e   : > { %p726_p12 = pnand %p725_p11, %p724_p10  ;;  %p730_p2 = scmp.lt.u32.totalorder %s728_s30, %s723_s27 }
  0x2f   : > { %p732_p6 = scmp.lt.u32.totalorder %s723_s27, %s899_s21 }
  0x30   : > { %p727_p13 = pneg %p726_p12  ;;  %p731_p3 = por %p730_p2, %p729_p0 }
  0x32   : > { %p733_p1 = por %p732_p6, %p731_p3 }
  0x34   : > { %p734_p4 = pnand %p733_p1, %p727_p13 }
  0x36   : > { %737 = shalt.err (!%p734_p4)
}
  0x37   : > { %s738_s8 = scalar_lea.vmem %s901_s24, 128  ;;  %s796_s9 = smov [#allocation2]  }
  0x38   : > { %p739_p5 = scmp.ne.s32.totalorder %s901_s24, %s738_s8  ;;  %s743_s11 = sshll.u32 %s796_s9, 4  ;;  %s744_s11 = int_to_ptr.vmem [resolvable:$false] %s743_s11 }
  0x39   : > { %s745_s12 = scalar_lea.vmem %s744_s11, 256  ;;  %p746_p10 = scmp.lt.s32.totalorder %s901_s24, %s744_s11 }
  0x3a   : > { %p741_p8 = pnand %p739_p5, %p725_p11  ;;  %p747_p12 = scmp.lt.s32.totalorder %s745_s12, %s738_s8 }
  0x3c   : > { %p742_p9 = pneg %p741_p8  ;;  %p748_p0 = por %p747_p12, %p746_p10 }
  0x3e   : > { %p749_p2 = pnand %p748_p0, %p742_p9 }
  0x40   : > { %752 = shalt.err (!%p749_p2)
}
  0x41   : > { %641 = dma.hbm_to_vmem [thread:$0]  (!%p903_p7), %s899_s21, 128, %s901_s24, %s907_s15, %s794_s6, %s794_s6, %s795_s7  }
  0x42   : > { %p987_p11 = scmp.ne.s32.totalorder %s984_s18, 0 }
  0x43   : > { %s170_s19 = sand.u32 (!%p987_p11), 1, %s783_s13   ;;  %p988_p13 = scmp.ne.s32.totalorder (!%p987_p11), %s983_s17, 0 }
  0x44   : > { %168 = sbr.rel (%p987_p11) target bundleno = 332 (0x14c), region = 32  ;;  %s552_s25 = sshll.u32 (!%p987_p11), %s170_s19, 3 }
  0x45   : > { %s171_s26 = scalar_lea.sflag (!%p987_p11), [#allocation3], %s170_s19  ;;  %s174_s20 = scalar_lea.vmem (!%p987_p11), [#allocation2], %s552_s25 }
  0x4b   : > { %770 = dma.done.wait (%p988_p13), %s171_s26, 128  }
  0x4c   : > { %772 = vsyncadd (%p988_p13), %s171_s26, 4294967168  ;;  %p989_p3 = scmp.eq.s32.totalorder %s838_s16, 0 }
  0x4e   : > { %774 = dma.done.wait (%p989_p3), [#allocation5], 1536   ;;  %p990_p6 = pmov %p989_p3 }
  0x4f   : > { %v797_v0 = vmov 0.0   ;;  %vm798_vm0 = vmmov 0   ;;  %v682_v1 = vld [vmem:[#allocation4 + $0x20] sm:$0xff]   ;;  %v684_v3 = vld [vmem:[#allocation4 + $0x28] sm:$0xff]   ;;  %v686_v5 = vld [vmem:[#allocation4 + $0x30] sm:$0xff]   ;;  %vm262_vm1 = vcmask 523264  }
  0x50   : > { %776 = vsyncadd (%p990_p6), [#allocation5], 4294965760  ;;  %592 = vmatprep.subr.bf16.mxu0 %v797_v0  ;;  %604 = vmatprep.subr.bf16.mxu1 %v797_v0  ;;  %v683_v2 = vld [vmem:[#allocation4] sm:$0xff]   ;;  %v685_v4 = vld [vmem:[#allocation4 + $0x8] sm:$0xff]   ;;  %p201_p7 = scmp.lt.s32.totalorder %s838_s16, 1  ;;  %vm463_vm2 = vcmask 916480  }
  0x51   : > { %600 = vmatprep.mubr.msk.bf16.mxu0 %vm798_vm0, %v797_v0  ;;  %612 = vmatprep.mubr.msk.bf16.mxu1 %vm798_vm0, %v797_v0  ;;  %v687_v6 = vld [vmem:[#allocation4 + $0x10] sm:$0xff]   ;;  %v688_v8 = vld [vmem:[#allocation4 + $0x38] sm:$0xff]   ;;  %v691_v14 = vld [vmem:[#allocation4 + $0x40] sm:$0xff]   ;;  %vm465_vm3 = vcmask 914432  }
  0x52   : > { %593 = vmatpush3.bf16.msra.mxu0 %v682_v1  ;;  %605 = vmatpush3.bf16.msra.mxu1 %v683_v2  ;;  %v690_v7 = vld [vmem:[%s174_s20] sm:$0xff]   ;;  %v692_v15 = vld [vmem:[#allocation4 + $0x48] sm:$0xff]   ;;  %s996_s16 = smov (!%p201_p7, %s838_s16), 1 }
  0x53   : > { %594 = vmatprep.subr.bf16.mxu0 %v797_v0  ;;  %606 = vmatprep.subr.bf16.mxu1 %v797_v0  ;;  %v232_v9 = vshrl.u32 %v690_v7, 16  ;;  %v234_v10 = vshll.u32 %v690_v7, 16  ;;  %v689_v11 = vld [vmem:[#allocation4 + $0x18] sm:$0xff]   ;;  %v693_v16 = vld [vmem:[#allocation4 + $0x50] sm:$0xff]   ;;  %v383_v18 = vrot.slane %v690_v7, 1  ;;  %s576_s17 = sshll.u32 %s996_s16, 4 }
  0x54   : > { %v694_v17 = vld [vmem:[#allocation4 + $0x58] sm:$0xff]   ;;  %v572_v30 = vld [vmem:[%s978_s2] ss:$0 sm:$0xff]  ;;  %s205_s24 = scalar_lea.vmem %s979_s3, %s576_s17 }
  0x55   : > { %v236_v12 = vrot.slane %v234_v10, 1 }
  0x56   : > { %595 = vmatpush3.bf16.msra.mxu0 %v684_v3  ;;  %607 = vmatpush3.bf16.msra.mxu1 %v685_v4 }
  0x57   : > { %596 = vmatprep.subr.bf16.mxu0 %v797_v0  ;;  %608 = vmatprep.subr.bf16.mxu1 %v797_v0  ;;  %v237_v13 = vor.u32 %v236_v12, %v232_v9 }
  0x5a   : > { %597 = vmatpush3.bf16.msra.mxu0 %v686_v5  ;;  %609 = vmatpush3.bf16.msra.mxu1 %v687_v6 }
  0x5b   : > { %598 = vmatprep.subr.bf16.mxu0 %v797_v0  ;;  %610 = vmatprep.subr.bf16.mxu1 %v797_v0 }
  0x5e   : > { %599 = vmatpush3.bf16.msra.mxu0 %v688_v8  ;;  %611 = vmatpush3.bf16.msra.mxu1 %v689_v11 }
  0x5f   : > { %616 = vmatprep.subr.bf16.mxu0 %v797_v0 }
  0x61   : > { %601 = vmatmul.mubr.msk.bf16.vlgmr.msra.gmra.mrb[0].mxu0 %vm262_vm1, %v237_v13  ;;  %613 = vmatmul.mubr.msk.bf16.vlgmr.msra.gmra.mrb[0].mxu1 %vm262_vm1, %v690_v7 }
  0x62   : > { %617 = vmatpush3.bf16.msra.mxu0 %v691_v14  ;;  %624 = vmatprep.mubr.msk.bf16.mxu0 %vm798_vm0, %v797_v0 }
  0x63   : > { %618 = vmatprep.subr.bf16.mxu0 %v797_v0 }
  0x66   : > { %619 = vmatpush3.bf16.msra.mxu0 %v692_v15 }
  0x67   : > { %620 = vmatprep.subr.bf16.mxu0 %v797_v0 }
  0x6a   : > { %621 = vmatpush3.bf16.msra.mxu0 %v693_v16 }
  0x6b   : > { %622 = vmatprep.subr.bf16.mxu0 %v797_v0 }
  0x6e   : > { %623 = vmatpush3.bf16.msra.mxu0 %v694_v17 }
  0x71   : > { %625 = vmatmul.mubr.msk.bf16.vlgmr.msra.gmra.mrb[4].mxu0 %vm262_vm1, %v383_v18 }
 0x134   : > { %v300_v19 = vpop.f32.mrb[0].mxu0  ;;  %v367_v20 = vpop.f32.mrb[0].mxu1 }
 0x135   : > { %v602_v21 = vpop.f32.mrb[1].mxu0  ;;  %v368_v22 = vadd.f32 %v367_v20, %v300_v19  ;;  %v614_v23 = vpop.f32.mrb[1].mxu1 }
 0x136   : > { %v303_v24 = vpop.f32.mrb[2].mxu0  ;;  %v370_v25 = vpop.f32.mrb[2].mxu1 }
 0x137   : > { %v603_v26 = vpop.f32.mrb[3].mxu0  ;;  %v371_v27 = vadd.f32 %v370_v25, %v303_v24  ;;  %v615_v28 = vpop.f32.mrb[3].mxu1 }
 0x144   : > { %v445_v29 = vpop.f32.mrb[4].mxu0 }
 0x145   : > { %v452_v31 = vadd.f32 %v445_v29, %v368_v22  ;;  %v626_v32 = vpop.f32.mrb[5].mxu0 }
 0x146   : > { %v448_v33 = vpop.f32.mrb[6].mxu0 }
 0x147   : > { %v461_v34 = vadd.f32 %v572_v30, %v452_v31  ;;  %v453_v35 = vadd.f32 %v448_v33, %v371_v27  ;;  %v627_v36 = vpop.f32.mrb[7].mxu0 }
 0x149   : > { %464 = vst.msk [vmem:[%s205_s24] sm:$0xff] %vm463_vm2, %v461_v34  ;;  %v462_v37 = vadd.f32 %v572_v30, %v453_v35 }
 0x14b   : > { %466 = vst.msk [vmem:[%s205_s24 + $0x8] sm:$0x3f] %vm465_vm3, %v462_v37 }
 0x14c PF: > { %p14_p1 = scmp.ge.s32.totalorder %s863_s22, 4   ;;  %s991_s12 = smov %s783_s13 }
 0x14d   : > { %s992_s13 = smov %s787_s14  ;;  %s993_s14 = smov %s892_s10 }
 0x14e   : > { %s994_s15 = smov %s863_s22  ;;  %16 = sbr.rel (!%p14_p1) target bundleno = 4 (0x4), region = 78 }
 0x155   :  { %488 = vsyncpa [#allocation3], 1 }
 0x156   :  { %490 = vsyncpa [#allocation3 + $0x1], 1 }
 0x157   :  { %491 = vsyncpa [#allocation5], 1 }

</bundles_post_ra>
